<compile_context>
chip_gen: v6e
topology: v6e:2x2x1
jax: 0.10.0
libtpu: 0.0.40
codegen_flags: <defaults>
</compile_context>

<pallas_src>
import functools

import jax
import jax.numpy as jnp
from jax.experimental import pallas as pl
from jax.experimental.pallas import tpu as pltpu


def _copy_kernel(x_ref, o_ref):
    # Fast path: permute fully expressed in BlockSpec index maps -> pure copy.
    o_ref[...] = x_ref[...]


def _downblock_kernel(x_ref, o_ref, *, scale, C):
    # General path.
    # x_ref block: (1, Hs_t, scale, Ws, scale*C)
    # o_ref block: (1, Hs_t, Ws, scale*scale*C)
    # The s2 sub-copies are contiguous in both source and destination, so one
    # contiguous assignment per s1 suffices (no inner s2 loop, wider lane stores).
    sc = scale * C
    for s1 in range(scale):  # static Python loop, scale is small
        o_ref[0, :, :, s1 * sc:(s1 + 1) * sc] = x_ref[0, :, s1, :, :]


def _pick_h_tile(Hs, row_bytes, target_bytes=2 * 1024 * 1024):
    """Largest divisor of Hs whose per-block footprint stays under target_bytes."""
    best = 1
    for d in range(1, Hs + 1):
        if Hs % d == 0 and d * row_bytes <= target_bytes:
            best = d
    return best


def downblock_nhwc(x_nhwc, scale):
    """Space-to-depth on an NHWC tensor.

    x_nhwc: (N, H, W, C) -> (N, H//scale, W//scale, scale*scale*C), output channel
    index k = s1*scale*C + s2*C + c (PyTorch DownBlock ordering).
    """
    N, H, W, C = x_nhwc.shape
    assert H % scale == 0 and W % scale == 0
    Hs, Ws = H // scale, W // scale
    sc = scale * C
    itemsize = jnp.dtype(x_nhwc.dtype).itemsize

    # Free reshape (no data movement): (N, H, W, C) -> (N, Hs, scale, Ws, scale*C)
    x_r = x_nhwc.reshape(N, Hs, scale, Ws, sc)
    out_shape = jax.ShapeDtypeStruct((N, Hs, Ws, scale * sc), x_nhwc.dtype)

    if sc % 128 == 0:
        # ---- Fast path: pure-DMA permute -------------------------------------
        # Legal because the out block's last dim (scale*C) is a multiple of 128.
        row_bytes = 2 * Ws * sc * itemsize          # in-row + out-row per Hs row
        Hs_t = _pick_h_tile(Hs, row_bytes)
        grid = (N, scale, Hs // Hs_t)
        fn = pl.pallas_call(
            _copy_kernel,
            out_shape=out_shape,
            grid_spec=pltpu.PrefetchScalarGridSpec(
                num_scalar_prefetch=0,
                grid=grid,
                in_specs=[
                    pl.BlockSpec((1, Hs_t, None, Ws, sc),
                                 lambda n, s1, h: (n, h, s1, 0, 0)),
                ],
                out_specs=pl.BlockSpec((1, Hs_t, Ws, sc),
                                       lambda n, s1, h: (n, h, 0, s1)),
            ),
            compiler_params=pltpu.CompilerParams(
                dimension_semantics=("parallel", "parallel", "parallel")),
        )
        return fn(x_r)

    # ---- General path (scale*C not a multiple of 128) -------------------------
    row_bytes = 2 * scale * Ws * sc * itemsize      # in-row + out-row per Hs row
    Hs_t = _pick_h_tile(Hs, row_bytes)
    grid = (N, Hs // Hs_t)
    kernel = functools.partial(_downblock_kernel, scale=scale, C=C)
    fn = pl.pallas_call(
        kernel,
        out_shape=out_shape,
        grid_spec=pltpu.PrefetchScalarGridSpec(
            num_scalar_prefetch=0,
            grid=grid,
            in_specs=[
                pl.BlockSpec((1, Hs_t, scale, Ws, sc),
                             lambda n, h: (n, h, 0, 0, 0)),
            ],
            out_specs=pl.BlockSpec((1, Hs_t, Ws, scale * sc),
                                   lambda n, h: (n, h, 0, 0)),
        ),
        compiler_params=pltpu.CompilerParams(
            dimension_semantics=("parallel", "parallel")),
    )
    return fn(x_r)


def downblock(x, scale):
    """PyTorch-parity entry point. x: (N, C, H, W) -> (N, C*scale**2, H//scale, W//scale).

    NOTE: the two NCHW<->NHWC transposes below are pure layout passes; if the
    surrounding model keeps activations in NHWC, call downblock_nhwc() directly
    and skip them (the op then costs ~1 HBM read + 1 HBM write).
    """
    x_nhwc = jnp.transpose(x, (0, 2, 3, 1))
    out_k = downblock_nhwc(x_nhwc, scale)           # (N, Hs, Ws, scale*scale*C)
    return jnp.transpose(out_k, (0, 3, 1, 2))


def downblock_reference(x, scale):
    """Pure-jnp mirror of the PyTorch DownBlock.forward."""
    n, c, h, w = x.shape
    y = x.reshape(n, c, h // scale, scale, w // scale, scale)
    y = jnp.transpose(y, (0, 3, 5, 1, 2, 4))
    return y.reshape(n, c * scale ** 2, h // scale, w // scale)


if __name__ == "__main__":
    key = jax.random.PRNGKey(0)
    k1, k2 = jax.random.split(key)

    # Config 1: module-spec shapes (scale*C = 8 -> general path).
    scale = 2
    N, C, H, W = 2, 4, 16, 16
    x = jax.random.normal(k1, (N, C, H, W), dtype=jnp.float32)
    out = jax.block_until_ready(downblock(x, scale))
    ref = downblock_reference(x, scale)
    assert out.shape == (N, C * scale ** 2, H // scale, W // scale), out.shape
    assert out.dtype == x.dtype
    assert jnp.allclose(out, ref), "Pallas DownBlock (general path) does not match reference"

    # Config 2: channel count that triggers the pure-DMA fast path (scale*C = 128).
    N2, C2, H2, W2 = 1, 64, 16, 16
    x2 = jax.random.normal(k2, (N2, C2, H2, W2), dtype=jnp.float32)
    out2 = jax.block_until_ready(downblock(x2, scale))
    ref2 = downblock_reference(x2, scale)
    assert out2.shape == (N2, C2 * scale ** 2, H2 // scale, W2 // scale), out2.shape
    assert jnp.allclose(out2, ref2), "Pallas DownBlock (fast path) does not match reference"

    print("KERNEL_OK")
</pallas_src>

<mosaic_0001>
module attributes {stable_mosaic.version = 11 : i64} {
  func.func @_downblock_kernel(%arg0: i32, %arg1: i32, %arg2: memref<1x8x2x8x8xf32, #tpu.memory_space<vmem>>, %arg3: memref<1x8x8x16xf32, #tpu.memory_space<vmem>>) attributes {dimension_semantics = [#tpu.dimension_semantics<parallel>, #tpu.dimension_semantics<parallel>], iteration_bounds = array<i64: 2, 1>, scalar_prefetch = 0 : i64, scratch_operands = 0 : i64, tpu.core_type = #tpu.core_type<tc>, window_params = [{transform_indices = @transform_0, window_bounds = array<i64: 1, 8, 2, 8, 8>}, {transform_indices = @transform_1, window_bounds = array<i64: 1, 8, 8, 16>}]} {
    %c0 = arith.constant 0 : index
    %c0_0 = arith.constant 0 : index
    %c0_1 = arith.constant 0 : index
    %c0_2 = arith.constant 0 : index
    %c0_3 = arith.constant 0 : index
    %0 = vector.load %arg2[%c0, %c0_0, %c0_1, %c0_2, %c0_3] : memref<1x8x2x8x8xf32, #tpu.memory_space<vmem>>, vector<1x8x1x8x8xf32>
    %1 = vector.shape_cast %0 : vector<1x8x1x8x8xf32> to vector<8x8x8xf32>
    %c0_4 = arith.constant 0 : index
    %c0_5 = arith.constant 0 : index
    %c0_6 = arith.constant 0 : index
    %c0_7 = arith.constant 0 : index
    %2 = vector.load %arg3[%c0_4, %c0_5, %c0_6, %c0_7] : memref<1x8x8x16xf32, #tpu.memory_space<vmem>>, vector<1x8x8x8xf32>
    %3 = vector.shape_cast %2 : vector<1x8x8x8xf32> to vector<8x8x8xf32>
    %4 = vector.shape_cast %1 : vector<8x8x8xf32> to vector<1x8x8x8xf32>
    tpu.vector_store %arg3[%c0_4, %c0_5, %c0_6, %c0_7], %4 {strides = array<i32>} : memref<1x8x8x16xf32, #tpu.memory_space<vmem>>, vector<1x8x8x8xf32>,
    %c0_8 = arith.constant 0 : index
    %c0_9 = arith.constant 0 : index
    %c1 = arith.constant 1 : index
    %c0_10 = arith.constant 0 : index
    %c0_11 = arith.constant 0 : index
    %5 = vector.load %arg2[%c0_8, %c0_9, %c1, %c0_10, %c0_11] : memref<1x8x2x8x8xf32, #tpu.memory_space<vmem>>, vector<1x8x1x8x8xf32>
    %6 = vector.shape_cast %5 : vector<1x8x1x8x8xf32> to vector<8x8x8xf32>
    %c0_12 = arith.constant 0 : index
    %c0_13 = arith.constant 0 : index
    %c0_14 = arith.constant 0 : index
    %c8 = arith.constant 8 : index
    %7 = vector.load %arg3[%c0_12, %c0_13, %c0_14, %c8] : memref<1x8x8x16xf32, #tpu.memory_space<vmem>>, vector<1x8x8x8xf32>
    %8 = vector.shape_cast %7 : vector<1x8x8x8xf32> to vector<8x8x8xf32>
    %9 = vector.shape_cast %6 : vector<8x8x8xf32> to vector<1x8x8x8xf32>
    tpu.vector_store %arg3[%c0_12, %c0_13, %c0_14, %c8], %9 {strides = array<i32>} : memref<1x8x8x16xf32, #tpu.memory_space<vmem>>, vector<1x8x8x8xf32>,
    return
  }
  func.func @transform_0(%arg0: i32, %arg1: i32) -> (i32, i32, i32, i32, i32) {
    %c0_i32 = arith.constant 0 : i32
    %c0_i32_0 = arith.constant 0 : i32
    %c0_i32_1 = arith.constant 0 : i32
    %c0_i32_2 = arith.constant 0 : i32
    return %arg0, %arg1, %c0_i32, %c0_i32_0, %c0_i32_1 : i32, i32, i32, i32, i32
  }
  func.func @transform_1(%arg0: i32, %arg1: i32) -> (i32, i32, i32, i32) {
    %c0_i32 = arith.constant 0 : i32
    %c0_i32_0 = arith.constant 0 : i32
    %c0_i32_1 = arith.constant 0 : i32
    return %arg0, %arg1, %c0_i32, %c0_i32_0 : i32, i32, i32, i32
  }
}

</mosaic_0001>

<bundles_post_ra>
// kernel: tpu_custom_call.1
= control target key start
LH: loop header
LB: loop body
LE: loop exit
PB: predicated region body
PF: predicated region fallthrough
CT: control target
= control target key end

     0   :  { %6 = vsyncpa [#allocation3], 0  ;;  %s752_s0 = inlined_call_operand.hbm [shape: f32[2,8,2,8,8], index: 0, kind: input, shape index: {}]   ;;  %s753_s1 = inlined_call_operand.hbm [shape: f32[2,8,8,16], index: 1, kind: output, shape index: {}]  }
   0x1   :  { %8 = vsyncpa [#allocation3 + $0x1], 0 }
   0x2   :  { %9 = vsyncpa [#allocation4], 0 }
   0x3   :  { %11 = vsyncpa [#allocation4 + $0x1], 0  ;;  %s543_s6 = smov 0   ;;  %s545_s7 = smov 0  }
   0x4   :  { %s547_s8 = smov 0   ;;  %s549_s9 = smov 0  }
   0x5   :  { %s551_s10 = smov 0   ;;  %s553_s11 = smov 0  }
   0x6 LB: > { %s326_s12 = sadd.s32 4294967295, %s525_s11   ;;  %s327_s13 = sadd.s32 4294967294, %s525_s11   ;;  %s525_s11 = sphi %s553_s11, %s17_s11   ;;  %s521_s10 = sphi %s551_s10, %s764_s10   ;;  %s517_s9 = sphi %s549_s9, %s763_s9   ;;  %s513_s8 = sphi %s547_s8, %s762_s8   ;;  %s509_s7 = sphi %s545_s7, %s761_s7   ;;  %s505_s6 = sphi %s543_s6, %s760_s6  }
   0x7   : > { %s29_s14 = sadd.s32 1, %s521_s10  ;;  %s38_s15 = sadd.s32 1, %s513_s8 }
   0x8   : > { %p31_p0 = scmp.ge.s32.totalorder %s29_s14, 2  ;;  %p45_p1 = scmp.ne.s32.totalorder %s513_s8, %s509_s7 }
   0x9   : > { %p46_p2 = scmp.eq.s32.totalorder %s525_s11, 0  ;;  %p51_p3 = scmp.ne.s32.totalorder %s509_s7, %s505_s6 }
   0xa   : > { %s766_s14 = smov (%p31_p0, %s29_s14), 0  ;;  %p52_p5 = scmp.eq.s32.totalorder %s326_s12, 0 }
   0xb   : > { %p584_p4 = por %p46_p2, %p45_p1  ;;  %s33_s17 = ssub.s32 %s521_s10, %s766_s14 }
   0xc   : > { %p77_p6 = scmp.eq.s32.totalorder %s326_s12, 1  ;;  %p36_p7 = scmp.eq.s32.totalorder %s33_s17, 0 }
   0xd   : > { %p590_p8 = por %p52_p5, %p51_p3  ;;  %p83_p10 = scmp.eq.s32.totalorder %s327_s13, 1 }
   0xe   : > { %p594_p9 = por %p77_p6, %p45_p1  ;;  %p363_p13 = scmp.lt.s32.totalorder %s525_s11, 2 }
   0xf   : > { %s599_s20 = scalar_select %p36_p7, %s513_s8, %s38_s15  }
  0x10   : > { %p601_p11 = por %p83_p10, %p51_p3  ;;  %s103_s22 = sand.u32 1, %s513_s8  }
  0x11   : > { %s330_s23 = sshll.u32 %s103_s22, 7  ;;  %s349_s24 = sshll.u32 %s521_s10, 11 }
  0x12   : > { %s116_s27 = scalar_lea.hbm %s752_s0, %s349_s24  ;;  %s107_s28 = scalar_lea.vmem [#allocation2], %s330_s23 }
  0x13   : > { %s117_s29 = sshll.u32 %s107_s28, 4  ;;  %p614_p0 = pnand %p363_p13, %p584_p4  ;;  %s118_s29 = int_to_ptr.vmem [resolvable:$true] %s117_s29 }
  0x14   : > { %p333_p1 = scmp.ge.s32.totalorder %s525_s11, 1  ;;  %s104_s2 = scalar_lea.sflag [#allocation3], %s103_s22 }
  0x15   : > { %p419_p2 = pneg %p614_p0  ;;  %s430_s3 = scalar_lea.vmem %s118_s29, 2048 }
  0x16   : > { %p431_p3 = scmp.ne.s32.totalorder %s118_s29, %s430_s3  ;;  %s527_s4 = smov [#allocation2]  }
  0x17   : > { %s435_s5 = sshll.u32 %s527_s4, 4  ;;  %s436_s5 = int_to_ptr.vmem [resolvable:$false] %s435_s5 }
  0x18   : > { %p433_p5 = pnand %p431_p3, %p419_p2  ;;  %s437_s12 = scalar_lea.vmem %s436_s5, 4096 }
  0x19   : > { %p438_p7 = scmp.lt.s32.totalorder %s118_s29, %s436_s5  ;;  %p439_p10 = scmp.lt.s32.totalorder %s437_s12, %s430_s3 }
  0x1a   : > { %p434_p6 = pneg %p433_p5 }
  0x1b   : > { %p440_p12 = por %p439_p10, %p438_p7 }
  0x1d   : > { %p441_p4 = pnand %p440_p12, %p434_p6 }
  0x1f   : > { %444 = shalt.err (!%p441_p4)
}
  0x20   : > { %s528_s13 = smov 128   ;;  %s529_s15 = smov 8  }
  0x21   : > { %358 = dma.hbm_to_vmem [thread:$0]  (!%p614_p0), %s116_s27, 2048, %s118_s29, %s104_s2, %s528_s13, %s528_s13, %s529_s15  }
  0x22   : > { %p125_p13 = scmp.lt.s32.totalorder %s525_s11, 3 }
  0x24   : > { %p126_p2 = pnand %p333_p1, %p125_p13 }
  0x25   : > { %s627_s16 = sand.u32 (!%p126_p2), 1, %s509_s7  }
  0x26   : > { %129 = sbr.rel (%p126_p2) target bundleno = 187 (0xbb), region = 24  ;;  %s334_s17 = sshll.u32 (!%p126_p2), %s627_s16, 7 }
  0x27   : > { %s132_s22 = scalar_lea.sflag (!%p126_p2), [#allocation3], %s627_s16  ;;  %s631_s23 = scalar_lea.vmem (!%p126_p2), [#allocation2], %s334_s17 }
  0x2b   : > { %496 = dma.done.wait (%p590_p8), %s132_s22, 2048  }
  0x2c   : > { %498 = vsyncadd (%p590_p8), %s132_s22, 4294965248  ;;  %s335_s24 = sshll.u32 %s627_s16, 6  ;;  %v338_v0 = vld [vmem:[%s631_s23 + $0x28] sm:$0xff]  ;;  %s530_s25 = smov 8   ;;  %vm164_vm0 = vcmask 64512   ;;  %v339_v2 = vld [vmem:[%s631_s23 + $0x38] sm:$0xff] }
  0x2d   : > { %v336_v1 = vld [vmem:[%s631_s23 + $0x8] sm:$0xff]  ;;  %194 = vrot.lane.b32.xlu1 %v338_v0, %s530_s25  ;;  %v337_v3 = vld [vmem:[%s631_s23 + $0x18] sm:$0xff]  ;;  %v158_v4 = vld [vmem:[%s631_s23 + $0x20] sm:$0xff]  ;;  %s647_s18 = scalar_lea.vmem [#allocation5], %s335_s24  ;;  %vm214_vm1 = vcmask 130112   ;;  %s350_s26 = sshll.u32 %s517_s9, 10 }
  0x2e   : > { %190 = vrot.lane.b32.xlu0 %v336_v1, %s530_s25  ;;  %v156_v5 = vld [vmem:[%s631_s23] sm:$0xff]  ;;  %v159_v6 = vld [vmem:[%s631_s23 + $0x30] sm:$0xff]  ;;  %167 = vst.msk [vmem:[%s647_s18 + $0x10] sm:$0xff] %vm164_vm0, %v158_v4  ;;  %s239_s27 = sshll.u32 %s647_s18, 4  ;;  %s697_s30 = scalar_lea.hbm %s753_s1, %s350_s26  ;;  %s699_s27 = int_to_ptr.vmem [resolvable:$true] %s239_s27 }
  0x2f   : > { %165 = vst.msk [vmem:[%s647_s18] sm:$0xff] %vm164_vm0, %v156_v5  ;;  %168 = vst.msk [vmem:[%s647_s18 + $0x18] sm:$0xff] %vm164_vm0, %v159_v6  ;;  %v157_v7 = vld [vmem:[%s631_s23 + $0x10] sm:$0xff]  ;;  %v160_v9 = vld [vmem:[%s631_s23 + $0x40] sm:$0xff]  ;;  %s224_s9 = scalar_lea.sflag [#allocation4], %s627_s16  ;;  %s445_s2 = scalar_lea.vmem %s699_s27, 1024 }
  0x30   : > { %v161_v8 = vld [vmem:[%s631_s23 + $0x50] sm:$0xff]  ;;  %166 = vst.msk [vmem:[%s647_s18 + $0x8] sm:$0xff] %vm164_vm0, %v157_v7  ;;  %169 = vst.msk [vmem:[%s647_s18 + $0x20] sm:$0xff] %vm164_vm0, %v160_v9  ;;  %v162_v11 = vld [vmem:[%s631_s23 + $0x60] sm:$0xff]  ;;  %p446_p8 = scmp.ne.s32.totalorder %s699_s27, %s445_s2  ;;  %s531_s3 = smov [#allocation5]  }
  0x31   : > { %196 = vrot.lane.b32.xlu1 %v339_v2, %s530_s25  ;;  %170 = vst.msk [vmem:[%s647_s18 + $0x28] sm:$0xff] %vm164_vm0, %v161_v8  ;;  %v163_v10 = vld [vmem:[%s631_s23 + $0x70] sm:$0xff]  ;;  %v341_v12 = vld [vmem:[%s631_s23 + $0x58] sm:$0xff]  ;;  %s449_s4 = sshll.u32 %s531_s3, 4  ;;  %s450_s4 = int_to_ptr.vmem [resolvable:$false] %s449_s4 }
  0x32   : > { %192 = vrot.lane.b32.xlu0 %v337_v3, %s530_s25  ;;  %v340_v13 = vld [vmem:[%s631_s23 + $0x48] sm:$0xff]  ;;  %172 = vst.msk [vmem:[%s647_s18 + $0x38] sm:$0xff] %vm164_vm0, %v163_v10  ;;  %171 = vst.msk [vmem:[%s647_s18 + $0x30] sm:$0xff] %vm164_vm0, %v162_v11  ;;  %p447_p12 = pnand %p446_p8, %p594_p9  ;;  %s451_s5 = scalar_lea.vmem %s450_s4, 2048 }
  0x33   : > { %v343_v14 = vld [vmem:[%s631_s23 + $0x78] sm:$0xff]  ;;  %v342_v15 = vld [vmem:[%s631_s23 + $0x68] sm:$0xff]  ;;  %p452_p1 = scmp.lt.s32.totalorder %s699_s27, %s450_s4  ;;  %p453_p3 = scmp.lt.s32.totalorder %s451_s5, %s445_s2 }
  0x34   : > { %p448_p0 = pneg %p447_p12 }
  0x35   : > { %200 = vrot.lane.b32.xlu1 %v341_v12, %s530_s25  ;;  %p454_p5 = por %p453_p3, %p452_p1 }
  0x36   : > { %198 = vrot.lane.b32.xlu0 %v340_v13, %s530_s25 }
  0x37   : > { %p455_p6 = pnand %p454_p5, %p448_p0 }
  0x39   : > { %204 = vrot.lane.b32.xlu1 %v343_v14, %s530_s25 }
  0x3a   : > { %202 = vrot.lane.b32.xlu0 %v342_v15, %s530_s25 }
  0x9f   : > { %v195_v16 = vpop.permute.xlu1 %194 }
  0xa0   : > { %v191_v17 = vpop.permute.xlu0 %190  ;;  %217 = vst.msk [vmem:[%s647_s18 + $0x10] sm:$0xff] %vm214_vm1, %v195_v16 }
  0xa1   : > { %215 = vst.msk [vmem:[%s647_s18] sm:$0xff] %vm214_vm1, %v191_v17 }
  0xa3   : > { %v197_v18 = vpop.permute.xlu1 %196 }
  0xa4   : > { %v193_v19 = vpop.permute.xlu0 %192  ;;  %218 = vst.msk [vmem:[%s647_s18 + $0x18] sm:$0xff] %vm214_vm1, %v197_v18 }
  0xa5   : > { %216 = vst.msk [vmem:[%s647_s18 + $0x8] sm:$0xff] %vm214_vm1, %v193_v19 }
  0xa7   : > { %v201_v20 = vpop.permute.xlu1 %200 }
  0xa8   : > { %v199_v21 = vpop.permute.xlu0 %198  ;;  %220 = vst.msk [vmem:[%s647_s18 + $0x28] sm:$0xff] %vm214_vm1, %v201_v20 }
  0xa9   : > { %219 = vst.msk [vmem:[%s647_s18 + $0x20] sm:$0xff] %vm214_vm1, %v199_v21 }
  0xab   : > { %v205_v22 = vpop.permute.xlu1 %204 }
  0xac   : > { %v203_v23 = vpop.permute.xlu0 %202  ;;  %222 = vst.msk [vmem:[%s647_s18 + $0x38] sm:$0xff] %vm214_vm1, %v205_v22 }
  0xad   : > { %221 = vst.msk [vmem:[%s647_s18 + $0x30] sm:$0xff] %vm214_vm1, %v203_v23 }
  0xae   : > { %458 = shalt.err (!%p455_p6)
}
  0xaf   : > { %s459_s12 = scalar_lea.hbm %s697_s30, 1024  ;;  %s463_s17 = scalar_lea.hbm %s753_s1, 2048 }
  0xb0   : > { %p460_p7 = scmp.ne.s32.totalorder %s697_s30, %s459_s12  ;;  %p464_p13 = scmp.lt.s32.totalorder %s697_s30, %s753_s1 }
  0xb1   : > { %p465_p2 = scmp.lt.s32.totalorder %s463_s17, %s459_s12 }
  0xb2   : > { %p461_p10 = pnand %p460_p7, %p594_p9 }
  0xb3   : > { %p466_p8 = por %p465_p2, %p464_p13 }
  0xb4   : > { %p462_p4 = pneg %p461_p10 }
  0xb6   : > { %p467_p12 = pnand %p466_p8, %p462_p4 }
  0xb8   : > { %470 = shalt.err (!%p467_p12)
}
  0xb9   : > { %s532_s24 = smov 128  }
  0xba   : > { %353 = dma.vmem_to_hbm [thread:$0]  (%p594_p9), %s699_s27, 1024, %s697_s30, %s224_s9, %s532_s24, %s532_s24, %s530_s25  }
  0xbb PF: > { %s254_s18 = sand.u32 1, %s505_s6   ;;  %p759_p0 = scmp.ge.s32.totalorder %s525_s11, 2 }
  0xbc   : > { %s255_s26 = scalar_lea.sflag [#allocation4], %s254_s18 }
  0xbd   : > { %p360_p1 = pnand %p759_p0, %p601_p11 }
  0xbf   : > { %p361_p3 = pneg %p360_p1 }
  0xc1   : > { %500 = dma.done.wait (%p361_p3), %s255_s26, 1024  }
  0xc2   : > { %502 = vsyncadd (%p361_p3), %s255_s26, 4294966272  ;;  %s17_s11 = sadd.s32 1, %s525_s11   ;;  %s760_s6 = smov %s509_s7 }
  0xc3   : > { %p14_p5 = scmp.ge.s32.totalorder %s17_s11, 4   ;;  %s761_s7 = smov %s513_s8 }
  0xc4   : > { %s762_s8 = smov %s599_s20  ;;  %s763_s9 = smov %s521_s10 }
  0xc5   : > { %s764_s10 = smov %s766_s14  ;;  %16 = sbr.rel (!%p14_p5) target bundleno = 6 (0x6), region = 70 }
  0xca   :  { %260 = vsyncpa [#allocation3], 1 }
  0xcb   :  { %262 = vsyncpa [#allocation3 + $0x1], 1 }
  0xcc   :  { %263 = vsyncpa [#allocation4], 1 }
  0xcd   :  { %265 = vsyncpa [#allocation4 + $0x1], 1 }

</bundles_post_ra>
